<compile_context>
chip_gen: v5e
topology: v5e:2x2
jax: 0.10.0
libtpu: 0.0.40
codegen_flags: <defaults>
</compile_context>

<pallas_src>
import functools

import jax
import jax.numpy as jnp
from jax import lax
from jax.experimental import pallas as pl
from jax.experimental.pallas import tpu as pltpu


def _abs_disc_sm_kernel(x_ref, lab_ref, o_ref, acc_ref, *,
                        lb_sm: float, n_rows: int, tile_n: int,
                        mask_rows: bool):
    k = pl.program_id(1)  # reduction step over the batch axis (last grid dim)

    @pl.when(k == 0)
    def _():
        acc_ref[...] = jnp.zeros_like(acc_ref)

    scale = jnp.float32(1.0 - lb_sm)
    x = x_ref[...].astype(jnp.float32)          # in-kernel cast (cheap VPU op)
    lab = lab_ref[...].astype(jnp.float32)
    diff = jnp.abs(x - scale * lab)             # (tile_n, tile_c) on VPU

    if mask_rows:
        # Last N-block may extend past the batch; zero out the padded rows so
        # they don't contaminate the sum.
        row = lax.broadcasted_iota(jnp.int32, diff.shape, 0) + k * tile_n
        diff = jnp.where(row < n_rows, diff, jnp.float32(0.0))

    # Partial sum over the batch (sublane) axis, accumulated in f32.
    acc_ref[...] += jnp.sum(diff, axis=0, keepdims=True)

    @pl.when(k == pl.num_programs(1) - 1)
    def _():
        o_ref[...] = acc_ref[...] * jnp.float32(1.0 / n_rows)


def _select_tiles(n: int, c: int, itemsize: int):
    """Pick (tile_n, tile_c) so 2 inputs x 2 pipeline buffers fit the budget."""
    input_budget = 16 * 1024 * 1024  # bytes for the double-buffered inputs

    # Batch tile: full N when small, otherwise a fixed 512-row slab (mult. of 8).
    tile_n = n if n <= 512 else 512

    # Largest lane tile (multiple of 128, capped at 2048) fitting the budget.
    max_tc = input_budget // (2 * 2 * tile_n * itemsize)
    max_tc = max(128, (max_tc // 128) * 128)
    max_tc = min(max_tc, 2048)

    if c <= max_tc:
        # Whole C fits in one tile; split in two when cleanly possible so the
        # "parallel" grid axis has >=2 steps (keeps both v7x TensorCores busy).
        if c % 256 == 0 and (c // 2) >= 128:
            tile_c = c // 2
        else:
            tile_c = c          # full-array dim (allowed even if not %128)
    else:
        tile_c = max_tc         # multiple of 128; last C block may be partial
    return tile_n, tile_c


def abs_disc_sm_v3(x: jax.Array, labels: jax.Array, lb_sm: float = 0.2) -> jax.Array:
    """Pallas implementation of ABS_disc_sm_v3.forward.

    x, labels: (N, C) arrays with values in [0, 1].
    Returns: (C,) float32 array = mean over batch of |x - (1 - lb_sm) * labels|.
    """
    assert x.shape == labels.shape and x.ndim == 2
    n, c = x.shape
    # TODO(synk): the PyTorch module asserts 0 <= x,labels <= 1 at runtime;
    # data-dependent host asserts are omitted inside the kernel.

    itemsize = jnp.dtype(x.dtype).itemsize
    tile_n, tile_c = _select_tiles(n, c, itemsize)
    grid_c = pl.cdiv(c, tile_c)
    grid_n = pl.cdiv(n, tile_n)
    mask_rows = (n % tile_n) != 0

    kernel = functools.partial(
        _abs_disc_sm_kernel, lb_sm=lb_sm, n_rows=n, tile_n=tile_n,
        mask_rows=mask_rows)

    cost = pl.CostEstimate(
        flops=3 * n * c,
        transcendentals=0,
        bytes_accessed=n * c * (itemsize + jnp.dtype(labels.dtype).itemsize) + c * 4,
    )

    out = pl.pallas_call(
        kernel,
        out_shape=jax.ShapeDtypeStruct((1, c), jnp.float32),
        grid_spec=pltpu.PrefetchScalarGridSpec(
            num_scalar_prefetch=0,
            # C axis first (parallel), reduction over N last (arbitrary).
            grid=(grid_c, grid_n),
            in_specs=[
                pl.BlockSpec((tile_n, tile_c), lambda j, k: (k, j)),
                pl.BlockSpec((tile_n, tile_c), lambda j, k: (k, j)),
            ],
            # Same output block across the N axis -> resident accumulator tile.
            out_specs=pl.BlockSpec((1, tile_c), lambda j, k: (0, j)),
            scratch_shapes=[pltpu.VMEM((1, tile_c), jnp.float32)],
        ),
        compiler_params=pltpu.CompilerParams(
            dimension_semantics=("parallel", "arbitrary"),
            vmem_limit_bytes=32 * 1024 * 1024,
        ),
        cost_estimate=cost,
    )(x, labels)

    return out[0]  # (C,)


def _reference(x, labels, lb_sm=0.2):
    labels = (1.0 - lb_sm) * labels.astype(jnp.float32)
    return jnp.mean(jnp.abs(x.astype(jnp.float32) - labels), axis=0)


if __name__ == "__main__":
    key = jax.random.PRNGKey(0)
    kx, kl = jax.random.split(key)

    N, C = 8, 256
    # Values constrained to [0, 1] as the module requires.
    x = jax.random.uniform(kx, (N, C), dtype=jnp.float32)
    labels = jax.random.uniform(kl, (N, C), dtype=jnp.float32)

    out = abs_disc_sm_v3(x, labels, lb_sm=0.2)
    out = jax.block_until_ready(out)

    ref = _reference(x, labels, lb_sm=0.2)
    assert out.shape == (C,)
    assert jnp.allclose(out, ref, atol=1e-6, rtol=1e-6), "mismatch vs reference"

    print("KERNEL_OK")
</pallas_src>

<mosaic_0001>
module attributes {stable_mosaic.version = 11 : i64} {
  func.func @_abs_disc_sm_kernel(%arg0: i32, %arg1: i32, %arg2: memref<8x128xf32, #tpu.memory_space<vmem>>, %arg3: memref<8x128xf32, #tpu.memory_space<vmem>>, %arg4: memref<1x128xf32, #tpu.memory_space<vmem>>, %arg5: memref<1x128xf32, #tpu.memory_space<vmem>>) attributes {dimension_semantics = [#tpu.dimension_semantics<parallel>, #tpu.dimension_semantics<arbitrary>], iteration_bounds = array<i64: 2, 1>, scalar_prefetch = 0 : i64, scratch_operands = 1 : i64, tpu.core_type = #tpu.core_type<tc>, window_params = [{transform_indices = @transform_0, window_bounds = array<i64: 8, 128>}, {transform_indices = @transform_1, window_bounds = array<i64: 8, 128>}, {transform_indices = @transform_2, window_bounds = array<i64: 1, 128>}]} {
    %c0_i32 = arith.constant 0 : i32
    %0 = arith.cmpi eq, %arg1, %c0_i32 : i32
    %1 = arith.extui %0 : i1 to i32
    %c0_i32_0 = arith.constant 0 : i32
    %2 = arith.cmpi ne, %1, %c0_i32_0 : i32
    scf.if %2 {
      %cst_11 = arith.constant 0.000000e+00 : f32
      %17 = vector.broadcast %cst_11 : f32 to vector<1x128xf32>
      %c0_12 = arith.constant 0 : index
      %c0_13 = arith.constant 0 : index
      %18 = vector.load %arg5[%c0_12, %c0_13] : memref<1x128xf32, #tpu.memory_space<vmem>>, vector<1x128xf32>
      tpu.vector_store %arg5[%c0_12, %c0_13], %17 {strides = array<i32>} : memref<1x128xf32, #tpu.memory_space<vmem>>, vector<1x128xf32>,
    } else {
    }
    %c0 = arith.constant 0 : index
    %c0_1 = arith.constant 0 : index
    %3 = vector.load %arg2[%c0, %c0_1] : memref<8x128xf32, #tpu.memory_space<vmem>>, vector<8x128xf32>
    %c0_2 = arith.constant 0 : index
    %c0_3 = arith.constant 0 : index
    %4 = vector.load %arg3[%c0_2, %c0_3] : memref<8x128xf32, #tpu.memory_space<vmem>>, vector<8x128xf32>
    %cst = arith.constant 8.000000e-01 : f32
    %5 = vector.broadcast %cst : f32 to vector<8x128xf32>
    %6 = arith.mulf %5, %4 : vector<8x128xf32>
    %7 = arith.subf %3, %6 : vector<8x128xf32>
    %8 = math.absf %7 : vector<8x128xf32>
    %c0_4 = arith.constant 0 : index
    %c0_5 = arith.constant 0 : index
    %9 = vector.load %arg5[%c0_4, %c0_5] : memref<1x128xf32, #tpu.memory_space<vmem>>, vector<1x128xf32>
    %cst_6 = arith.constant dense<0.000000e+00> : vector<128xf32>
    %10 = vector.multi_reduction <add>, %8, %cst_6 [0] : vector<8x128xf32> to vector<128xf32>
    %11 = vector.shape_cast %10 : vector<128xf32> to vector<1x128xf32>
    %12 = arith.addf %9, %11 : vector<1x128xf32>
    %c0_7 = arith.constant 0 : index
    %c0_8 = arith.constant 0 : index
    %13 = vector.load %arg5[%c0_7, %c0_8] : memref<1x128xf32, #tpu.memory_space<vmem>>, vector<1x128xf32>
    tpu.vector_store %arg5[%c0_7, %c0_8], %12 {strides = array<i32>} : memref<1x128xf32, #tpu.memory_space<vmem>>, vector<1x128xf32>,
    %c0_i32_9 = arith.constant 0 : i32
    %14 = arith.cmpi eq, %arg1, %c0_i32_9 : i32
    %15 = arith.extui %14 : i1 to i32
    %c0_i32_10 = arith.constant 0 : i32
    %16 = arith.cmpi ne, %15, %c0_i32_10 : i32
    scf.if %16 {
      %c0_11 = arith.constant 0 : index
      %c0_12 = arith.constant 0 : index
      %17 = vector.load %arg5[%c0_11, %c0_12] : memref<1x128xf32, #tpu.memory_space<vmem>>, vector<1x128xf32>
      %cst_13 = arith.constant 1.250000e-01 : f32
      %18 = vector.broadcast %cst_13 : f32 to vector<1x128xf32>
      %19 = arith.mulf %17, %18 : vector<1x128xf32>
      %c0_14 = arith.constant 0 : index
      %c0_15 = arith.constant 0 : index
      %20 = vector.load %arg4[%c0_14, %c0_15] : memref<1x128xf32, #tpu.memory_space<vmem>>, vector<1x128xf32>
      tpu.vector_store %arg4[%c0_14, %c0_15], %19 {strides = array<i32>} : memref<1x128xf32, #tpu.memory_space<vmem>>, vector<1x128xf32>,
    } else {
    }
    return
  }
  func.func @transform_0(%arg0: i32, %arg1: i32) -> (i32, i32) {
    %c0_i32 = arith.constant 0 : i32
    return %arg1, %arg0 : i32, i32
  }
  func.func @transform_1(%arg0: i32, %arg1: i32) -> (i32, i32) {
    %c0_i32 = arith.constant 0 : i32
    return %arg1, %arg0 : i32, i32
  }
  func.func @transform_2(%arg0: i32, %arg1: i32) -> (i32, i32) {
    %c0_i32 = arith.constant 0 : i32
    %c0_i32_0 = arith.constant 0 : i32
    return %c0_i32, %arg0 : i32, i32
  }
}

</mosaic_0001>

<bundles_post_ra>
// kernel: tpu_custom_call.1
= control target key start
LH: loop header
LB: loop body
LE: loop exit
PB: predicated region body
PF: predicated region fallthrough
CT: control target
= control target key end

     0   :  { %7 = vsyncpa [#allocation4], 0  ;;  %s732_s0 = inlined_call_operand.hbm [shape: f32[8,256], index: 0, kind: input, shape index: {}]   ;;  %s733_s1 = inlined_call_operand.hbm [shape: f32[8,256], index: 1, kind: input, shape index: {}]   ;;  %s734_s2 = inlined_call_operand.hbm [shape: f32[1,256], index: 2, kind: output, shape index: {}]  }
   0x1   :  { %9 = vsyncpa [#allocation4 + $0x1], 0 }
   0x2   :  { %10 = vsyncpa [#allocation7], 0 }
   0x3   :  { %12 = vsyncpa [#allocation7 + $0x1], 0 }
   0x4   :  { %13 = vsyncpa [#allocation5], 0 }
   0x5   :  { %15 = vsyncpa [#allocation5 + $0x1], 0  ;;  %s603_s9 = smov 0   ;;  %s605_s10 = smov 0  }
   0x6   :  { %s607_s11 = smov 0   ;;  %s609_s12 = smov 0  }
   0x7   :  { %s611_s13 = smov 0   ;;  %s613_s14 = smov 0  }
   0x8 LB: > { %s358_s15 = sadd.s32 4294967295, %s585_s14   ;;  %s359_s16 = sadd.s32 4294967294, %s585_s14   ;;  %s585_s14 = sphi %s613_s14, %s21_s14   ;;  %s581_s13 = sphi %s611_s13, %s743_s13   ;;  %s577_s12 = sphi %s609_s12, %s742_s12   ;;  %s573_s11 = sphi %s607_s11, %s741_s11   ;;  %s569_s10 = sphi %s605_s10, %s740_s10   ;;  %s565_s9 = sphi %s603_s9, %s739_s9  }
   0x9   : > { %s33_s17 = sadd.s32 1, %s581_s13  ;;  %s42_s18 = sadd.s32 1, %s573_s11 }
   0xa   : > { %p35_p0 = scmp.ge.s32.totalorder %s33_s17, 2  ;;  %p49_p1 = scmp.ne.s32.totalorder %s573_s11, %s569_s10 }
   0xb   : > { %p50_p2 = scmp.eq.s32.totalorder %s585_s14, 0  ;;  %p55_p3 = scmp.ne.s32.totalorder %s569_s10, %s565_s9 }
   0xc   : > { %s745_s17 = smov (%p35_p0, %s33_s17), 0  ;;  %p56_p5 = scmp.eq.s32.totalorder %s358_s15, 0 }
   0xd   : > { %p644_p4 = por %p50_p2, %p49_p1  ;;  %s38_s20 = ssub.s32 %s581_s13, %s745_s17 }
   0xe   : > { %p107_p6 = scmp.eq.s32.totalorder %s358_s15, 1  ;;  %p40_p7 = scmp.eq.s32.totalorder %s38_s20, 0 }
   0xf   : > { %p650_p8 = por %p56_p5, %p55_p3  ;;  %p113_p10 = scmp.eq.s32.totalorder %s359_s16, 1 }
  0x10   : > { %p654_p9 = por %p107_p6, %p49_p1  ;;  %p361_p12 = scmp.ge.s32.totalorder %s585_s14, 2 }
  0x11   : > { %s659_s23 = scalar_select %p40_p7, %s573_s11, %s42_s18  }
  0x12   : > { %p661_p11 = por %p113_p10, %p55_p3  ;;  %p388_p13 = scmp.lt.s32.totalorder %s585_s14, 2 }
  0x13   : > { %s133_s25 = sand.u32 1, %s573_s11   ;;  %s363_s27 = sshll.u32 %s581_s13, 3 }
  0x14   : > { %s362_s26 = sshll.u32 %s133_s25, 3  ;;  %s143_s30 = scalar_lea.hbm %s732_s0, %s363_s27 }
  0x15   : > { %s137_s3 = scalar_lea.vmem [#allocation3], %s362_s26  ;;  %s145_s5 = sshll.u32 %s143_s30, 4  ;;  %s146_s5 = int_to_ptr.hbm [resolvable:$true] %s145_s5 }
  0x16   : > { %s147_s4 = sshll.u32 %s137_s3, 4  ;;  %p378_p0 = pnand %p388_p13, %p644_p4  ;;  %s148_s4 = int_to_ptr.vmem [resolvable:$true] %s147_s4 }
  0x17   : > { %p366_p1 = scmp.ge.s32.totalorder %s585_s14, 1  ;;  %p173_p2 = scmp.lt.s32.totalorder %s585_s14, 3 }
  0x18   : > { %s134_s6 = scalar_lea.sflag [#allocation4], %s133_s25  ;;  %s164_s15 = scalar_lea.hbm %s733_s1, %s363_s27 }
  0x19   : > { %380 = dma.hbm_to_vmem [thread:$0]  (!%p378_p0), %s146_s5, 128, %s148_s4, %s134_s6  }
  0x1a   : > { %p174_p3 = pnand %p366_p1, %p173_p2  ;;  %s158_s16 = scalar_lea.vmem [#allocation6], %s362_s26 }
  0x1b   : > { %s168_s18 = sshll.u32 %s158_s16, 4  ;;  %s166_s20 = sshll.u32 %s164_s15, 4  ;;  %s169_s18 = int_to_ptr.vmem [resolvable:$true] %s168_s18  ;;  %s167_s20 = int_to_ptr.hbm [resolvable:$true] %s166_s20 }
  0x1c   : > { %s155_s28 = scalar_lea.sflag [#allocation7], %s133_s25  ;;  %177 = sbr.rel (%p174_p3) target bundleno = 70 (0x46), region = 28 }
  0x1d   : > { %383 = dma.hbm_to_vmem [thread:$0]  (!%p378_p0), %s167_s20, 128, %s169_s18, %s155_s28  }
  0x1e   : > { %s680_s19 = sand.u32 (!%p174_p3), 1, %s569_s10  }
  0x1f   : > { %s367_s29 = sshll.u32 (!%p174_p3), %s680_s19, 3  ;;  %s180_s30 = scalar_lea.sflag (!%p174_p3), [#allocation4], %s680_s19 }
  0x20   : > { %s183_s3 = scalar_lea.vmem (!%p174_p3), [#allocation3], %s367_s29 }
  0x21   : > { %552 = dma.done.wait (%p650_p8), %s180_s30, 128  }
  0x22   : > { %554 = vsyncadd (%p650_p8), %s180_s30, 4294967168  ;;  %s190_s26 = scalar_lea.sflag [#allocation7], %s680_s19  ;;  %s193_s25 = scalar_lea.vmem [#allocation6], %s367_s29 }
  0x23   : > { %556 = dma.done.wait (%p650_p8), %s190_s26, 128  }
  0x24   : > { %558 = vsyncadd (%p650_p8), %s190_s26, 4294967168  ;;  %v587_v0 = vmov 0.0   ;;  %v224_v1 = vld [vmem:[%s183_s3] sm:$0xff]  ;;  %v225_v2 = vld [vmem:[%s193_s25] sm:$0xff]  ;;  %s253_s4 = scalar_lea.hbm %s734_s2, %s577_s12  ;;  %s218_s5 = scalar_lea.vmem [#allocation8], %s680_s19 }
  0x25   : > { %223 = vst [vmem:[#allocation2] sm:$0x1] %v587_v0  ;;  %v226_v3 = vmul.f32 0.8, %v225_v2  ;;  %s255_s6 = sshll.u32 %s218_s5, 4  ;;  %s257_s7 = sshll.u32 %s253_s4, 4  ;;  %s256_s6 = int_to_ptr.vmem [resolvable:$true] %s255_s6  ;;  %s258_s7 = int_to_ptr.hbm [resolvable:$true] %s257_s7 }
  0x26   : > { %s245_s8 = scalar_lea.sflag [#allocation5], %s680_s19  ;;  %s513_s15 = sshra.s32 %s258_s7, 4  ;;  %s514_s15 = int_to_ptr.hbm [resolvable:$true] %s513_s15 }
  0x27   : > { %v227_v4 = vsub.f32 %v224_v1, %v226_v3  ;;  %s515_s16 = scalar_lea.hbm %s514_s15, 1  ;;  %s519_s12 = scalar_lea.hbm %s734_s2, 2 }
  0x28   : > { %p516_p4 = scmp.ne.s32.totalorder %s514_s15, %s515_s16  ;;  %p520_p7 = scmp.lt.s32.totalorder %s514_s15, %s734_s2 }
  0x29   : > { %v228_v5 = vand.u32 2147483647, %v227_v4  ;;  %p521_p8 = scmp.lt.s32.totalorder %s519_s12, %s515_s16 }
  0x2a   : > { %p517_p5 = pnand %p516_p4, %p654_p9 }
  0x2b   : > { %v230_v6 = vrot.slane %v228_v5, 4  ;;  %p522_p10 = por %p521_p8, %p520_p7 }
  0x2c   : > { %v229_v11 = vld [vmem:[#allocation2] sm:$0x1]  ;;  %p518_p6 = pneg %p517_p5 }
  0x2d   : > { %v231_v7 = vadd.f32 %v230_v6, %v228_v5 }
  0x2e   : > { %p523_p13 = pnand %p522_p10, %p518_p6 }
  0x2f   : > { %v232_v8 = vrot.slane %v231_v7, 2 }
  0x31   : > { %v233_v9 = vadd.f32 %v232_v8, %v231_v7 }
  0x33   : > { %v234_v10 = vrot.slane %v233_v9, 1 }
  0x35   : > { %v235_v12 = vadd.f32 %v234_v10, %v233_v9 }
  0x37   : > { %v236_v13 = vadd.f32 %v235_v12, %v229_v11 }
  0x39   : > { %237 = vst [vmem:[#allocation2] sm:$0x1] %v236_v13 }
  0x40   : > { %v241_v14 = vld [vmem:[#allocation2] sm:$0x1] }
  0x41   : > { %v242_v15 = vmul.f32 0.125, %v241_v14 }
  0x43   : > { %243 = vst [vmem:[%s218_s5] sm:$0x1] %v242_v15 }
  0x44   : > { %526 = shalt.err (!%p523_p13)
}
  0x45   : > { %375 = dma.vmem_to_hbm [thread:$0]  (%p654_p9), %s256_s6, 16, %s258_s7, %s245_s8  }
  0x46 PF: > { %s269_s19 = sand.u32 1, %s565_s9   ;;  %p385_p0 = pnand %p361_p12, %p661_p11 }
  0x47   : > { %s270_s30 = scalar_lea.sflag [#allocation5], %s269_s19 }
  0x48   : > { %p386_p1 = pneg %p385_p0 }
  0x4a   : > { %560 = dma.done.wait (%p386_p1), %s270_s30, 16  }
  0x4b   : > { %562 = vsyncadd (%p386_p1), %s270_s30, 4294967280  ;;  %s21_s14 = sadd.s32 1, %s585_s14   ;;  %s739_s9 = smov %s569_s10 }
  0x4c   : > { %p18_p2 = scmp.ge.s32.totalorder %s21_s14, 4   ;;  %s740_s10 = smov %s573_s11 }
  0x4d   : > { %s741_s11 = smov %s659_s23  ;;  %s742_s12 = smov %s581_s13 }
  0x4e   : > { %s743_s13 = smov %s745_s17  ;;  %20 = sbr.rel (!%p18_p2) target bundleno = 8 (0x8), region = 94 }
  0x53   :  { %275 = vsyncpa [#allocation4], 1 }
  0x54   :  { %277 = vsyncpa [#allocation4 + $0x1], 1 }
  0x55   :  { %278 = vsyncpa [#allocation7], 1 }
  0x56   :  { %280 = vsyncpa [#allocation7 + $0x1], 1 }
  0x57   :  { %281 = vsyncpa [#allocation5], 1 }
  0x58   :  { %283 = vsyncpa [#allocation5 + $0x1], 1 }

</bundles_post_ra>
